<compile_context>
chip_gen: v5e
topology: v5e:2x2
jax: 0.10.0
libtpu: 0.0.40
codegen_flags: <defaults>
</compile_context>

<pallas_src>
import functools

import jax
import jax.numpy as jnp
import numpy as np
from jax import lax
from jax.experimental import pallas as pl
from jax.experimental.pallas import tpu as pltpu


def _round_up(x, m):
    return (x + m - 1) // m * m


def _pick_row_tile(r, cap=1024):
    """Largest multiple of 8 <= cap that divides r (so no row padding).

    Falls back to min(cap, round_up(r, 8)) with sentinel-padded tail rows
    when no such divisor exists (e.g. odd r).
    """
    start = (min(cap, r) // 8) * 8
    for cand in range(start, 0, -8):
        if r % cand == 0:
            return cand
    return min(cap, _round_up(r, 8))


def _char_cnn_kernel(idx_ref, w_ref, b_ref, o_ref):
    """Fused (gather + pad + conv1d k=3 p=1 + bias) as a single matmul.

    idx_ref: (TR, 3) int32  per-row tap indices into the fused weight:
             col0 = id[s-1] + 0*V, col1 = id[s] + V, col2 = id[s+1] + 2*V,
             with -1 used as a "no contribution" sentinel (sequence boundary
             zero padding / padded rows).
    w_ref  : (K, Hp)        fused (embedding @ conv-tap) weights, zero padded.
    b_ref  : (1, H)  f32    conv bias (unpadded).
    o_ref  : (TR, H)        output rows (flattened (b, s)), H-wide (no lane pad).
    """
    tr, h = o_ref.shape
    k = w_ref.shape[0]

    idx = idx_ref[...]                                        # (TR, 3) int32
    lanes = lax.broadcasted_iota(jnp.int32, (tr, k), 1)        # (TR, K)

    # 3-tap one-hot: at most 3 lanes per row are 1; the three tap ranges
    # [0,V) / [V,2V) / [2V,3V) are disjoint and -1 never matches.
    oh = ((lanes == idx[:, 0:1])
          | (lanes == idx[:, 1:2])
          | (lanes == idx[:, 2:3])).astype(w_ref.dtype)        # (TR, K)

    acc = jnp.dot(oh, w_ref[...], preferred_element_type=jnp.float32)  # (TR, Hp)
    o_ref[...] = (acc[:, :h] + b_ref[...]).astype(o_ref.dtype)


@functools.partial(jax.jit, static_argnames=("compute_dtype",))
def char_cnn_forward(input_ids, emb_table, conv_w, conv_b,
                     compute_dtype=jnp.float32):
    """Forward pass of Char (CNN mode), inference (dropout = identity).

    input_ids : (B, S) int32 char ids
    emb_table : (V, E) float32 embedding weights
    conv_w    : (H, E, 3) float32 (PyTorch Conv1d weight layout: out, in, k)
    conv_b    : (H,) float32
    returns   : (B, S, H) float32  (== PyTorch get_all_hiddens output)
    """
    B, S = input_ids.shape
    V, E = emb_table.shape
    H = conv_w.shape[0]

    # --- tiny parameter-side precompute (fused embedding x conv-tap weight) ---
    # conv tap t uses x[s + t - 1]; W_tap[t] = conv_w[:, :, t].T : (E, H)
    w_taps = jnp.transpose(conv_w, (2, 1, 0))                   # (3, E, H)
    w_fused = jnp.einsum("ve,teh->tvh", emb_table, w_taps)      # (3, V, H)
    w_fused = w_fused.reshape(3 * V, H)

    K = _round_up(3 * V, 128)
    Hp = _round_up(H, 128)                  # matmul lane width (MXU-aligned)
    w_pad = jnp.zeros((K, Hp), compute_dtype).at[:3 * V, :H].set(
        w_fused.astype(compute_dtype))
    bias = conv_b.astype(jnp.float32).reshape(1, H)

    # --- tiny index-side precompute (shifts + conv zero-padding as sentinels) --
    ids = input_ids.astype(jnp.int32)
    sent = jnp.full((B, 1), -1, jnp.int32)
    prev = jnp.concatenate([sent, ids[:, :-1]], axis=1)                 # tap 0
    cur = ids + V                                                       # tap 1
    nxt = jnp.concatenate([ids[:, 1:] + 2 * V, sent], axis=1)           # tap 2
    idx3 = jnp.stack([prev, cur, nxt], axis=-1).reshape(B * S, 3)       # (R, 3)

    # Flatten all (b, s) positions into rows; many rows per grid step.
    R = B * S
    TR = _pick_row_tile(R, cap=1024)
    R_pad = _round_up(R, TR)
    if R_pad != R:
        idx3 = jnp.concatenate(
            [idx3, jnp.full((R_pad - R, 3), -1, jnp.int32)], axis=0)

    cost = pl.CostEstimate(
        flops=2 * R_pad * K * Hp,
        transcendentals=0,
        bytes_accessed=(R_pad * (3 * 4 + H * 4)
                        + K * Hp * int(np.dtype(compute_dtype).itemsize)
                        + H * 4),
    )

    out = pl.pallas_call(
        _char_cnn_kernel,
        out_shape=jax.ShapeDtypeStruct((R_pad, H), jnp.float32),
        grid_spec=pltpu.PrefetchScalarGridSpec(
            num_scalar_prefetch=0,
            grid=(R_pad // TR,),
            in_specs=[
                pl.BlockSpec((TR, 3), lambda r: (r, 0)),
                pl.BlockSpec((K, Hp), lambda r: (0, 0)),   # weight resident
                pl.BlockSpec((1, H), lambda r: (0, 0)),    # bias resident
            ],
            out_specs=pl.BlockSpec((TR, H), lambda r: (r, 0)),
        ),
        compiler_params=pltpu.CompilerParams(
            dimension_semantics=("parallel",)),
        cost_estimate=cost,
    )(idx3, w_pad, bias)

    if R_pad != R:
        out = out[:R]          # drop bias-only padded rows (only ragged case)
    return out.reshape(B, S, H)


def _reference_forward(input_ids, emb_table, conv_w, conv_b):
    """Pure-JAX reference (conv_general_dilated) for correctness checking."""
    emb = jnp.take(emb_table, input_ids, axis=0)            # (B, S, E)
    x = jnp.transpose(emb, (0, 2, 1))                        # (B, E, S) NCL
    y = lax.conv_general_dilated(
        x, conv_w, window_strides=(1,), padding=((1, 1),),
        dimension_numbers=("NCH", "OIH", "NCH"))
    y = y + conv_b[None, :, None]
    return jnp.transpose(y, (0, 2, 1))                       # (B, S, H)


if __name__ == "__main__":
    # Small shapes consistent with the module: Char("CNN", alphabet_size=20,
    # embedding_dim=8, hidden_dim=16, dropout=0.5, gpu=False)
    alphabet_size = 20
    embedding_dim = 8
    hidden_dim = 16
    batch = 2
    seq = 8

    key = jax.random.PRNGKey(0)
    k_ids, k_emb, k_w, k_b = jax.random.split(key, 4)

    emb_scale = np.sqrt(3.0 / embedding_dim)
    emb_table = jax.random.uniform(
        k_emb, (alphabet_size, embedding_dim),
        minval=-emb_scale, maxval=emb_scale, dtype=jnp.float32)

    fan_in = embedding_dim * 3
    w_scale = np.sqrt(1.0 / fan_in)
    conv_w = jax.random.uniform(
        k_w, (hidden_dim, embedding_dim, 3),
        minval=-w_scale, maxval=w_scale, dtype=jnp.float32)
    conv_b = jax.random.uniform(
        k_b, (hidden_dim,), minval=-w_scale, maxval=w_scale, dtype=jnp.float32)

    input_ids = jax.random.randint(
        k_ids, (batch, seq), minval=0, maxval=alphabet_size, dtype=jnp.int32)
    seq_lengths = jnp.full((batch,), seq, dtype=jnp.int32)  # unused in CNN mode

    out = char_cnn_forward(input_ids, emb_table, conv_w, conv_b)
    out = jax.block_until_ready(out)

    ref = _reference_forward(input_ids, emb_table, conv_w, conv_b)
    np.testing.assert_allclose(np.asarray(out), np.asarray(ref),
                               rtol=1e-5, atol=1e-5)
    assert out.shape == (batch, seq, hidden_dim)

    print("KERNEL_OK")
</pallas_src>

<mosaic_0001>
module attributes {stable_mosaic.version = 11 : i64} {
  func.func @_char_cnn_kernel(%arg0: i32, %arg1: memref<16x3xi32, #tpu.memory_space<vmem>>, %arg2: memref<128x128xf32, #tpu.memory_space<vmem>>, %arg3: memref<1x16xf32, #tpu.memory_space<vmem>>, %arg4: memref<16x16xf32, #tpu.memory_space<vmem>>) attributes {dimension_semantics = [#tpu.dimension_semantics<parallel>], iteration_bounds = array<i64: 1>, scalar_prefetch = 0 : i64, scratch_operands = 0 : i64, tpu.core_type = #tpu.core_type<tc>, window_params = [{transform_indices = @transform_0, window_bounds = array<i64: 16, 3>}, {pipeline_mode = #tpu.pipeline_mode<synchronous>, transform_indices = @transform_1, window_bounds = array<i64: 128, 128>}, {pipeline_mode = #tpu.pipeline_mode<synchronous>, transform_indices = @transform_2, window_bounds = array<i64: 1, 16>}, {transform_indices = @transform_3, window_bounds = array<i64: 16, 16>}]} {
    %c0 = arith.constant 0 : index
    %c0_0 = arith.constant 0 : index
    %0 = vector.load %arg1[%c0, %c0_0] : memref<16x3xi32, #tpu.memory_space<vmem>>, vector<16x3xi32>
    %1 = tpu.iota {dimensions = array<i32: 1>} : vector<16x128xi32>
    %2 = vector.extract_strided_slice %0 {offsets = [0, 0], sizes = [16, 1], strides = [1, 1]} : vector<16x3xi32> to vector<16x1xi32>
    %3 = vector.broadcast %2 : vector<16x1xi32> to vector<16x128xi32>
    %4 = arith.cmpi eq, %1, %3 : vector<16x128xi32>
    %5 = vector.extract_strided_slice %0 {offsets = [0, 1], sizes = [16, 1], strides = [1, 1]} : vector<16x3xi32> to vector<16x1xi32>
    %6 = vector.broadcast %5 : vector<16x1xi32> to vector<16x128xi32>
    %7 = arith.cmpi eq, %1, %6 : vector<16x128xi32>
    %8 = arith.ori %4, %7 : vector<16x128xi1>
    %9 = vector.extract_strided_slice %0 {offsets = [0, 2], sizes = [16, 1], strides = [1, 1]} : vector<16x3xi32> to vector<16x1xi32>
    %10 = vector.broadcast %9 : vector<16x1xi32> to vector<16x128xi32>
    %11 = arith.cmpi eq, %1, %10 : vector<16x128xi32>
    %12 = arith.ori %8, %11 : vector<16x128xi1>
    %13 = arith.extui %12 : vector<16x128xi1> to vector<16x128xi32>
    %14 = arith.sitofp %13 : vector<16x128xi32> to vector<16x128xf32>
    %c0_1 = arith.constant 0 : index
    %c0_2 = arith.constant 0 : index
    %15 = vector.load %arg2[%c0_1, %c0_2] : memref<128x128xf32, #tpu.memory_space<vmem>>, vector<128x128xf32>
    %cst = arith.constant dense<0.000000e+00> : vector<16x128xf32>
    %16 = tpu.matmul %14, %15, %cst {dimension_numbers = #tpu.dot_dimension_numbers<[1], [0], [0], [1], [0, 0, 1, 1], [], []>} : vector<16x128xf32>, vector<128x128xf32>, vector<16x128xf32> -> vector<16x128xf32>
    %17 = vector.extract_strided_slice %16 {offsets = [0, 0], sizes = [16, 16], strides = [1, 1]} : vector<16x128xf32> to vector<16x16xf32>
    %c0_3 = arith.constant 0 : index
    %c0_4 = arith.constant 0 : index
    %18 = vector.load %arg3[%c0_3, %c0_4] : memref<1x16xf32, #tpu.memory_space<vmem>>, vector<1x16xf32>
    %19 = vector.broadcast %18 : vector<1x16xf32> to vector<16x16xf32>
    %20 = arith.addf %17, %19 : vector<16x16xf32>
    %c0_5 = arith.constant 0 : index
    %c0_6 = arith.constant 0 : index
    %21 = vector.load %arg4[%c0_5, %c0_6] : memref<16x16xf32, #tpu.memory_space<vmem>>, vector<16x16xf32>
    tpu.vector_store %arg4[%c0_5, %c0_6], %20 {strides = array<i32>} : memref<16x16xf32, #tpu.memory_space<vmem>>, vector<16x16xf32>,
    return
  }
  func.func @transform_0(%arg0: i32) -> (i32, i32) {
    %c0_i32 = arith.constant 0 : i32
    %c0_i32_0 = arith.constant 0 : i32
    return %arg0, %c0_i32 : i32, i32
  }
  func.func @transform_1(%arg0: i32) -> (i32, i32) {
    %c0_i32 = arith.constant 0 : i32
    %c0_i32_0 = arith.constant 0 : i32
    %c0_i32_1 = arith.constant 0 : i32
    return %c0_i32, %c0_i32_0 : i32, i32
  }
  func.func @transform_2(%arg0: i32) -> (i32, i32) {
    %c0_i32 = arith.constant 0 : i32
    %c0_i32_0 = arith.constant 0 : i32
    %c0_i32_1 = arith.constant 0 : i32
    return %c0_i32, %c0_i32_0 : i32, i32
  }
  func.func @transform_3(%arg0: i32) -> (i32, i32) {
    %c0_i32 = arith.constant 0 : i32
    %c0_i32_0 = arith.constant 0 : i32
    return %arg0, %c0_i32 : i32, i32
  }
}

</mosaic_0001>

<bundles_post_ra>
// kernel: char_cnn_forward.1
= control target key start
LH: loop header
LB: loop body
LE: loop exit
PB: predicated region body
PF: predicated region fallthrough
CT: control target
= control target key end

     0   :  { %v175_v2 = vmov 1   ;;  %v176_v3 = vmov 0   ;;  %v177_v5 = vmov 2   ;;  %s262_s0 = inlined_call_operand.vmem [shape: s32[16,3], index: 0, kind: input, shape index: {}]   ;;  %s263_s1 = inlined_call_operand.vmem [shape: f32[128,128], index: 1, kind: input, shape index: {}]   ;;  %s264_s2 = inlined_call_operand.vmem [shape: f32[1,16], index: 2, kind: input, shape index: {}]   ;;  %s265_s3 = inlined_call_operand.hbm [shape: f32[16,16], index: 3, kind: output, shape index: {}]  }
   0x1   :  { %v15_v0 = vld [vmem:[%s262_s0] sm:$0xff]  ;;  %v66_v1 = vld [vmem:[%s263_s1 + $0x78] sm:$0xff]  ;;  %145 = vset.pattern.permute.xlu1 %v175_v2  ;;  %144 = vset.pattern.permute.xlu0 %v176_v3  ;;  %v65_v4 = vld [vmem:[%s263_s1 + $0x70] sm:$0xff] }
   0x2   :  { %28 = vperm.xlu1 %145, %v15_v0   ;;  %20 = vperm.xlu0 %144, %v15_v0   ;;  %v64_v6 = vld [vmem:[%s263_s1 + $0x68] sm:$0xff] }
   0x3   :  { %146 = vset.pattern.permute.xlu2 %v177_v5  ;;  %67 = vmatpush.msra.mxu0 %v66_v1 }
   0x4   :  { %38 = vperm.xlu2 %146, %v15_v0   ;;  %121 = vmatpush.msra.mxu1 %v66_v1 }
   0x5   :  { %8 = vsyncpa [#allocation3], 0  ;;  %68 = vmatpush.msra.mxu0 %v65_v4  ;;  %v63_v7 = vld [vmem:[%s263_s1 + $0x60] sm:$0xff]  ;;  %v16_v8 = vld [vmem:[%s262_s0 + $0x8] sm:$0xff]  ;;  %v17_v21 = vlaneseq  ;;  %v178_v26 = vmov 1.0   ;;  %vm96_vm10 = vcmask 130048  }
   0x6   :  { %122 = vmatpush.msra.mxu1 %v65_v4  ;;  %v62_v9 = vld [vmem:[%s263_s1 + $0x58] sm:$0xff]  ;;  %v61_v10 = vld [vmem:[%s263_s1 + $0x50] sm:$0xff]  ;;  %v60_v11 = vld [vmem:[%s263_s1 + $0x48] sm:$0xff]  ;;  %s179_s21 = smov [#allocation2]   ;;  %s105_s25 = sshll.u32 %s265_s3, 4  ;;  %s106_s25 = int_to_ptr.hbm [resolvable:$true] %s105_s25 }
   0x7   :  { %69 = vmatpush.msra.mxu0 %v64_v6  ;;  %v59_v12 = vld [vmem:[%s263_s1 + $0x40] sm:$0xff]  ;;  %v58_v13 = vld [vmem:[%s263_s1 + $0x38] sm:$0xff]  ;;  %v57_v14 = vld [vmem:[%s263_s1 + $0x30] sm:$0xff]  ;;  %v18_v22 = vand.u32 127, %v17_v21  ;;  %s103_s22 = sshll.u32 %s179_s21, 4  ;;  %s180_s26 = smov 128   ;;  %s104_s22 = int_to_ptr.vmem [resolvable:$true] %s103_s22 }
   0x8   :  { %123 = vmatpush.msra.mxu1 %v64_v6  ;;  %v56_v15 = vld [vmem:[%s263_s1 + $0x28] sm:$0xff]  ;;  %v55_v16 = vld [vmem:[%s263_s1 + $0x20] sm:$0xff]  ;;  %v54_v17 = vld [vmem:[%s263_s1 + $0x18] sm:$0xff]  ;;  %s181_s27 = smov 8  }
   0x9   :  { %70 = vmatpush.msra.mxu0 %v63_v7  ;;  %v53_v18 = vld [vmem:[%s263_s1 + $0x10] sm:$0xff]  ;;  %v52_v19 = vld [vmem:[%s263_s1 + $0x8] sm:$0xff]  ;;  %v51_v20 = vld [vmem:[%s263_s1] sm:$0xff] }
   0xa   :  { %31 = vperm.xlu1 %145, %v16_v8   ;;  %23 = vperm.xlu0 %144, %v16_v8   ;;  %v148_v30 = vld [vmem:[%s264_s2] ss:$0 sm:$0xff] }
   0xb   :  { %71 = vmatpush.msra.mxu0 %v62_v9  ;;  %124 = vmatpush.msra.mxu1 %v63_v7 }
   0xc   :  { %41 = vperm.xlu2 %146, %v16_v8  }
   0xd   :  { %72 = vmatpush.msra.mxu0 %v61_v10  ;;  %125 = vmatpush.msra.mxu1 %v62_v9 }
   0xf   :  { %73 = vmatpush.msra.mxu0 %v60_v11  ;;  %126 = vmatpush.msra.mxu1 %v61_v10 }
  0x11   :  { %74 = vmatpush.msra.mxu0 %v59_v12  ;;  %127 = vmatpush.msra.mxu1 %v60_v11 }
  0x12   :  { %147 = vset.pattern.permute.xlu0 %v177_v5 }
  0x13   :  { %75 = vmatpush.msra.mxu0 %v58_v13  ;;  %128 = vmatpush.msra.mxu1 %v59_v12 }
  0x15   :  { %76 = vmatpush.msra.mxu0 %v57_v14  ;;  %129 = vmatpush.msra.mxu1 %v58_v13 }
  0x17   :  { %77 = vmatpush.msra.mxu0 %v56_v15  ;;  %130 = vmatpush.msra.mxu1 %v57_v14 }
  0x19   :  { %131 = vmatpush.msra.mxu1 %v56_v15  ;;  %78 = vmatpush.msra.mxu0 %v55_v16 }
  0x1b   :  { %132 = vmatpush.msra.mxu1 %v55_v16  ;;  %79 = vmatpush.msra.mxu0 %v54_v17 }
  0x1d   :  { %133 = vmatpush.msra.mxu1 %v54_v17  ;;  %80 = vmatpush.msra.mxu0 %v53_v18 }
  0x1f   :  { %134 = vmatpush.msra.mxu1 %v53_v18  ;;  %81 = vmatpush.msra.mxu0 %v52_v19 }
  0x21   :  { %135 = vmatpush.msra.mxu1 %v52_v19  ;;  %82 = vmatpush.msra.mxu0 %v51_v20 }
  0x23   :  { %136 = vmatpush.msra.mxu1 %v51_v20 }
  0x5e   :  { %v39_v23 = vpop.permute.xlu2 %38 }
  0x5f   :  { %vm43_vm0 = vcmp.eq.s32.totalorder %v18_v22, %v39_v23 }
  0x66   :  { %v42_v27 = vpop.permute.xlu2 %41 }
  0x67   :  { %vm44_vm7 = vcmp.eq.s32.totalorder %v18_v22, %v42_v27 }
  0x74   :  { %v29_v24 = vpop.permute.xlu1 %28  ;;  %v21_v25 = vpop.permute.xlu0 %20 }
  0x75   :  { %vm33_vm1 = vcmp.eq.s32.totalorder %v18_v22, %v29_v24  ;;  %vm25_vm2 = vcmp.eq.s32.totalorder %v18_v22, %v21_v25 }
  0x76   :  { %vm35_vm3 = vmor %vm25_vm2, %vm33_vm1 }
  0x77   :  { %vm45_vm4 = vmor %vm35_vm3, %vm43_vm0 }
  0x78   :  { %119 = vmatmul.msk.f32.vlgmr.msra.gmra.mxu0 %vm45_vm4, %v178_v26 }
  0x7c   :  { %v32_v28 = vpop.permute.xlu1 %31  ;;  %v24_v29 = vpop.permute.xlu0 %23 }
  0x7d   :  { %vm34_vm5 = vcmp.eq.s32.totalorder %v18_v22, %v32_v28  ;;  %vm26_vm6 = vcmp.eq.s32.totalorder %v18_v22, %v24_v29 }
  0x7e   :  { %vm36_vm8 = vmor %vm26_vm6, %vm34_vm5 }
  0x7f   :  { %vm46_vm9 = vmor %vm36_vm8, %vm44_vm7 }
  0x80   :  { %120 = vmatmul.msk.f32.vlgmr.msra.gmra.mxu1 %vm46_vm9, %v178_v26 }
  0xf5   :  { %v84_v31 = vpop.f32.mrf.mxu0 }
  0xf6   :  { %v94_v32 = vadd.f32 %v148_v30, %v84_v31 }
  0xf8   :  { %97 = vst.msk [vmem:[#allocation2] sm:$0xff] %vm96_vm10, %v94_v32 }
  0xfd   :  { %v87_v33 = vpop.f32.mrf.mxu1 }
  0xfe   :  { %v95_v34 = vadd.f32 %v148_v30, %v87_v33 }
 0x100   :  { %98 = vst.msk [vmem:[#allocation2 + $0x8] sm:$0xff] %vm96_vm10, %v95_v34 }
 0x101   :  { %111 = dma.vmem_to_hbm [thread:$0]  %s104_s22, 256, %s106_s25, [#allocation3], %s180_s26, %s180_s26, %s181_s27  }
 0x102   :  { %173 = dma.done.wait [#allocation3], 256  }
 0x103   :  { %174 = vsyncadd [#allocation3], 4294967040 }
 0x104   :  { %116 = vsyncpa [#allocation3], 1 }

</bundles_post_ra>
